<compile_context>
chip_gen: v6e
topology: v6e:2x2x1
jax: 0.10.0
libtpu: 0.0.40
codegen_flags: <defaults>
</compile_context>

<pallas_src>
import jax
import jax.numpy as jnp
from jax.experimental import pallas as pl
from jax.experimental.pallas import tpu as pltpu  # noqa: F401  (TPU backend)

BATCH = 2
SEQ = 8
FEATURES = 128          # d_model; lane-dense (== 128-lane vreg width)
EPS = 1e-6              # LayerNormalization eps (closure constant, not an input)


# ------------------------------------------------------------------------------
# Fused Encoder-final LayerNormalization kernel (single block, no grid).
#   out = alpha * (x - mean) / (std + eps) + bias
#   (torch.Tensor.std default: unbiased estimator, ddof = 1)
# ------------------------------------------------------------------------------
def encoder_norm_kernel(x_ref, ab_ref, out_ref):
    # x_ref:   (R, F)   all rows (R = B*S), native input dtype
    # ab_ref:  (2, F)   row 0 = alpha, row 1 = bias (f32)
    # out_ref: (R, F)   same dtype as input
    x = x_ref[...].astype(jnp.float32)                     # upcast in-register
    ab = ab_ref[...]
    alpha = ab[0:1, :]                                     # (1, F)
    bias = ab[1:2, :]                                      # (1, F)

    mean = jnp.sum(x, axis=-1, keepdims=True) * (1.0 / FEATURES)        # (R, 1)
    d = x - mean                                                        # (R, F)
    var = jnp.sum(d * d, axis=-1, keepdims=True) * (1.0 / (FEATURES - 1))
    std = jnp.sqrt(var)                                                 # (R, 1)
    inv = pl.reciprocal(std + EPS, approx=False)           # exact; kernel is not VPU-bound
    out_ref[...] = (alpha * (d * inv) + bias).astype(out_ref.dtype)


def encoder_forward(params, x, mask):
    """Pallas-backed Encoder.forward(x, mask)."""
    # TODO(synk): `Encoder.layers` is an abstract nn.ModuleList with no concrete
    # layer class in the spec; the layer loop is treated as empty (identity), so
    # `mask` is unused.  Only the final LayerNormalization runs (this kernel).
    del mask
    B, S, F = x.shape
    R = B * S
    x2 = x.reshape(R, F)                                   # free, row-major contiguous
    ab = jnp.stack([params["alpha"], params["bias"]], axis=0).astype(jnp.float32)

    out = pl.pallas_call(
        encoder_norm_kernel,
        out_shape=jax.ShapeDtypeStruct((R, F), x.dtype),
        in_specs=[
            pl.BlockSpec((R, F), lambda: (0, 0)),          # whole x in one block
            pl.BlockSpec((2, F), lambda: (0, 0)),          # packed alpha/bias
        ],
        out_specs=pl.BlockSpec((R, F), lambda: (0, 0)),
    )(x2, ab)
    return out.reshape(B, S, F)


# ------------------------------------------------------------------------------
# Pure-JAX reference (mirrors the PyTorch forward) for a correctness check.
# ------------------------------------------------------------------------------
def encoder_ref(params, x):
    mean = jnp.mean(x, axis=-1, keepdims=True)
    std = jnp.std(x, axis=-1, keepdims=True, ddof=1)   # torch.std default: unbiased
    return params["alpha"] * (x - mean) / (std + EPS) + params["bias"]


def init_params():
    # Matches PyTorch init: alpha = ones(features), bias = zeros(features)
    return {
        "alpha": jnp.ones((FEATURES,), jnp.float32),
        "bias": jnp.zeros((FEATURES,), jnp.float32),
    }


if __name__ == "__main__":
    key = jax.random.PRNGKey(0)
    kx, km = jax.random.split(key, 2)

    params = init_params()
    x = jax.random.normal(kx, (BATCH, SEQ, FEATURES), jnp.float32)
    # padding mask (kept for API parity with Encoder.forward; unused by the
    # empty layer stack)
    mask = (jax.random.uniform(km, (BATCH, 1, 1, SEQ)) > 0.1).astype(jnp.float32)

    out = encoder_forward(params, x, mask)
    out = jax.block_until_ready(out)

    ref = encoder_ref(params, x)
    assert out.shape == (BATCH, SEQ, FEATURES)
    assert bool(jnp.all(jnp.isfinite(out)))
    assert float(jnp.max(jnp.abs(out - ref))) < 1e-4
    print("KERNEL_OK")
</pallas_src>

<mosaic_0001>
module attributes {stable_mosaic.version = 11 : i64} {
  func.func @encoder_norm_kernel(%arg0: memref<16x128xf32, #tpu.memory_space<vmem>>, %arg1: memref<2x128xf32, #tpu.memory_space<vmem>>, %arg2: memref<16x128xf32, #tpu.memory_space<vmem>>) attributes {dimension_semantics = [], scalar_prefetch = 0 : i64, scratch_operands = 0 : i64, tpu.core_type = #tpu.core_type<tc>} {
    %c0 = arith.constant 0 : index
    %c0_0 = arith.constant 0 : index
    %0 = vector.load %arg0[%c0, %c0_0] : memref<16x128xf32, #tpu.memory_space<vmem>>, vector<16x128xf32>
    %c0_1 = arith.constant 0 : index
    %c0_2 = arith.constant 0 : index
    %1 = vector.load %arg1[%c0_1, %c0_2] : memref<2x128xf32, #tpu.memory_space<vmem>>, vector<2x128xf32>
    %2 = vector.extract_strided_slice %1 {offsets = [0, 0], sizes = [1, 128], strides = [1, 1]} : vector<2x128xf32> to vector<1x128xf32>
    %3 = vector.extract_strided_slice %1 {offsets = [1, 0], sizes = [1, 128], strides = [1, 1]} : vector<2x128xf32> to vector<1x128xf32>
    %cst = arith.constant dense<0.000000e+00> : vector<16xf32>
    %4 = vector.multi_reduction <add>, %0, %cst [1] : vector<16x128xf32> to vector<16xf32>
    %5 = vector.shape_cast %4 : vector<16xf32> to vector<16x1xf32>
    %cst_3 = arith.constant 7.812500e-03 : f32
    %6 = vector.broadcast %cst_3 : f32 to vector<16x1xf32>
    %7 = arith.mulf %5, %6 : vector<16x1xf32>
    %8 = vector.broadcast %7 : vector<16x1xf32> to vector<16x128xf32>
    %9 = arith.subf %0, %8 : vector<16x128xf32>
    %10 = arith.mulf %9, %9 : vector<16x128xf32>
    %cst_4 = arith.constant dense<0.000000e+00> : vector<16xf32>
    %11 = vector.multi_reduction <add>, %10, %cst_4 [1] : vector<16x128xf32> to vector<16xf32>
    %12 = vector.shape_cast %11 : vector<16xf32> to vector<16x1xf32>
    %cst_5 = arith.constant 0.00787401571 : f32
    %13 = vector.broadcast %cst_5 : f32 to vector<16x1xf32>
    %14 = arith.mulf %12, %13 : vector<16x1xf32>
    %15 = math.sqrt %14 : vector<16x1xf32>
    %cst_6 = arith.constant 9.99999997E-7 : f32
    %16 = vector.broadcast %cst_6 : f32 to vector<16x1xf32>
    %17 = arith.addf %15, %16 : vector<16x1xf32>
    %18 = tpu.reciprocal %17 : vector<16x1xf32> -> vector<16x1xf32>
    %19 = vector.broadcast %18 : vector<16x1xf32> to vector<16x128xf32>
    %20 = arith.mulf %9, %19 : vector<16x128xf32>
    %21 = vector.broadcast %2 : vector<1x128xf32> to vector<16x128xf32>
    %22 = arith.mulf %21, %20 : vector<16x128xf32>
    %23 = vector.broadcast %3 : vector<1x128xf32> to vector<16x128xf32>
    %24 = arith.addf %22, %23 : vector<16x128xf32>
    %c0_7 = arith.constant 0 : index
    %c0_8 = arith.constant 0 : index
    %25 = vector.load %arg2[%c0_7, %c0_8] : memref<16x128xf32, #tpu.memory_space<vmem>>, vector<16x128xf32>
    tpu.vector_store %arg2[%c0_7, %c0_8], %24 {strides = array<i32>} : memref<16x128xf32, #tpu.memory_space<vmem>>, vector<16x128xf32>,
    return
  }
}

</mosaic_0001>

<bundles_post_ra>
// kernel: tpu_custom_call.1
= control target key start
LH: loop header
LB: loop body
LE: loop exit
PB: predicated region body
PF: predicated region fallthrough
CT: control target
= control target key end

     0   :  { %7 = vsyncpa [#allocation3], 0  ;;  %s223_s0 = inlined_call_operand.hbm [shape: f32[16,128], index: 0, kind: input, shape index: {}]   ;;  %s224_s1 = inlined_call_operand.hbm [shape: f32[2,128], index: 1, kind: input, shape index: {}]   ;;  %s225_s2 = inlined_call_operand.hbm [shape: f32[16,128], index: 2, kind: output, shape index: {}]  }
   0x1   :  { %8 = vsyncpa [#allocation6], 0 }
   0x2   :  { %9 = vsyncpa [#allocation4], 0  ;;  %s188_s9 = smov [#allocation2]  }
   0x3   :  { %s15_s10 = sshll.u32 %s188_s9, 4  ;;  %s16_s10 = int_to_ptr.vmem [resolvable:$true] %s15_s10 }
   0x4   :  { %s130_s11 = scalar_lea.vmem %s16_s10, 256  ;;  %p135_p1 = scmp.lt.s32.totalorder %s16_s10, %s16_s10 }
   0x5   :  { %p131_p0 = scmp.ne.s32.totalorder %s16_s10, %s130_s11  ;;  %p136_p2 = scmp.lt.s32.totalorder %s130_s11, %s130_s11 }
   0x7   :  { %p137_p3 = por %p136_p2, %p135_p1 }
   0x9   :  { %p138_p4 = pnand %p137_p3, %p131_p0 }
   0xb   :  { %141 = shalt.err (!%p138_p4)
}
   0xc   :  { %s189_s12 = smov 128   ;;  %s190_s13 = smov 8  }
   0xd   :  { %21 = dma.hbm_to_vmem [thread:$0]  %s223_s0, 256, %s16_s10, [#allocation3], %s189_s12, %s189_s12, %s190_s13  }
   0xe   :  { %s191_s16 = smov [#allocation5]  }
   0xf   :  { %s28_s17 = sshll.u32 %s191_s16, 4  ;;  %s29_s17 = int_to_ptr.vmem [resolvable:$true] %s28_s17 }
  0x10   :  { %s150_s18 = scalar_lea.vmem %s29_s17, 32  ;;  %p155_p6 = scmp.lt.s32.totalorder %s29_s17, %s29_s17 }
  0x11   :  { %p151_p5 = scmp.ne.s32.totalorder %s29_s17, %s150_s18  ;;  %p156_p7 = scmp.lt.s32.totalorder %s150_s18, %s150_s18 }
  0x13   :  { %p157_p8 = por %p156_p7, %p155_p6 }
  0x15   :  { %p158_p9 = pnand %p157_p8, %p151_p5 }
  0x17   :  { %161 = shalt.err (!%p158_p9)
}
  0x18   :  { %31 = dma.hbm_to_vmem [thread:$0]  %s224_s1, 32, %s29_s17, [#allocation6]  }
  0x19   :  { %182 = dma.done.wait [#allocation3], 256  }
  0x1a   :  { %183 = vsyncadd [#allocation3], 4294967040 }
  0x1b   :  { %184 = dma.done.wait [#allocation6], 32  }
  0x1c   :  { %185 = vsyncadd [#allocation6], 4294967264  ;;  %v38_v0 = vld [vmem:[#allocation2] sm:$0xff]  ;;  %v39_v1 = vld [vmem:[#allocation2 + $0x8] sm:$0xff]  ;;  %v77_v24 = vlaneseq  ;;  %s192_s0 = smov [#allocation7]  }
  0x1d   :  { %41 = vadd.xlane.f32.xlu0 %v38_v0  ;;  %v40_v29 = vld [vmem:[#allocation5] sm:$0x3]  ;;  %s96_s1 = sshll.u32 %s192_s0, 4  ;;  %s97_s1 = int_to_ptr.vmem [resolvable:$true] %s96_s1 }
  0x1e   :  { %v78_v27 = vshrl.u32 %v77_v24, 7  ;;  %s162_s21 = scalar_lea.vmem %s97_s1, 256  ;;  %p167_p11 = scmp.lt.s32.totalorder %s97_s1, %s97_s1 }
  0x1f   :  { %p163_p10 = scmp.ne.s32.totalorder %s97_s1, %s162_s21  ;;  %p168_p12 = scmp.lt.s32.totalorder %s162_s21, %s162_s21 }
  0x20   :  { %v79_v28 = vsub.s32 0, %v78_v27  ;;  %v85_v30 = vsub.s32 1, %v78_v27 }
  0x21   :  { %43 = vadd.xlane.f32.xlu0 %v39_v1  ;;  %p169_p13 = por %p168_p12, %p167_p11 }
  0x22   :  { %v80_v31 = vrot.slane %v40_v29, %v79_v28  ;;  %v86_v34 = vrot.slane %v40_v29, %v85_v30 }
  0x23   :  { %p170_p0 = pnand %p169_p13, %p163_p10 }
  0xa6   :  { %v42_v2 = vpop.xlane.xlu0 %41 }
  0xa7   :  { %v45_v3 = vmul.f32 0.0078125, %v42_v2 }
  0xa9   :  { %v47_v4 = vsub.f32 %v38_v0, %v45_v3 }
  0xaa   :  { %v44_v5 = vpop.xlane.xlu0 %43 }
  0xab   :  { %v46_v6 = vmul.f32 0.0078125, %v44_v5  ;;  %v49_v7 = vmul.f32 %v47_v4, %v47_v4 }
  0xad   :  { %v48_v8 = vsub.f32 %v39_v1, %v46_v6  ;;  %51 = vadd.xlane.f32.xlu1 %v49_v7 }
  0xaf   :  { %v50_v9 = vmul.f32 %v48_v8, %v48_v8 }
  0xb1   :  { %53 = vadd.xlane.f32.xlu1 %v50_v9 }
 0x136   :  { %v52_v10 = vpop.xlane.xlu1 %51 }
 0x137   :  { %v55_v11 = vmul.f32 0.007874016, %v52_v10 }
 0x139   :  { %114 = vrsqrt.f32 %v55_v11  ;;  %vm59_vm0 = vcmp.eq.f32.partialorder %v55_v11, inf  ;;  %v62_v16 = vand.u32 2147483648, %v55_v11  ;;  %vm61_vm1 = vcmp.eq.f32.partialorder %v55_v11, 0.0 }
 0x13a   :  { %v54_v12 = vpop.xlane.xlu1 %53 }
 0x13b   :  { %v56_v13 = vmul.f32 0.007874016, %v54_v12 }
 0x13d   :  { %116 = vrsqrt.f32 %v56_v13  ;;  %vm66_vm2 = vcmp.eq.f32.partialorder %v56_v13, inf  ;;  %v69_v22 = vand.u32 2147483648, %v56_v13  ;;  %vm68_vm3 = vcmp.eq.f32.partialorder %v56_v13, 0.0 }
 0x146   :  { %v115_v14 = vpop.eup %114 }
 0x147   :  { %v58_v15 = vmul.f32 %v115_v14, %v55_v11 }
 0x149   :  { %v60_v17 = vsel %vm59_vm0, %v55_v11, %v58_v15 }
 0x14a   :  { %v117_v18 = vpop.eup %116  ;;  %v63_v19 = vsel %vm61_vm1, %v62_v16, %v60_v17 }
 0x14b   :  { %v71_v20 = vadd.f32 1e-06, %v63_v19  ;;  %v65_v21 = vmul.f32 %v117_v18, %v56_v13 }
 0x14d   :  { %118 = vrcp.f32 %v71_v20  ;;  %v67_v23 = vsel %vm66_vm2, %v56_v13, %v65_v21 }
 0x14e   :  { %v70_v25 = vsel %vm68_vm3, %v69_v22, %v67_v23 }
 0x14f   :  { %v72_v26 = vadd.f32 1e-06, %v70_v25 }
 0x151   :  { %120 = vrcp.f32 %v72_v26 }
 0x15a   :  { %v119_v32 = vpop.eup %118 }
 0x15b   :  { %v75_v33 = vmul.f32 %v119_v32, %v47_v4 }
 0x15d   :  { %v81_v35 = vmul.f32 %v80_v31, %v75_v33 }
 0x15e   :  { %v121_v36 = vpop.eup %120 }
 0x15f   :  { %v76_v37 = vmul.f32 %v121_v36, %v48_v8  ;;  %v87_v38 = vadd.f32 %v86_v34, %v81_v35 }
 0x161   :  { %v82_v39 = vmul.f32 %v80_v31, %v76_v37  ;;  %89 = vst [vmem:[#allocation7] sm:$0xff] %v87_v38 }
 0x163   :  { %v88_v40 = vadd.f32 %v86_v34, %v82_v39 }
 0x165   :  { %90 = vst [vmem:[#allocation7 + $0x8] sm:$0xff] %v88_v40 }
 0x166   :  { %173 = shalt.err (!%p170_p0)
}
 0x167   :  { %102 = dma.vmem_to_hbm [thread:$0]  %s97_s1, 256, %s225_s2, [#allocation4], %s189_s12, %s189_s12, %s190_s13  }
 0x168   :  { %186 = dma.done.wait [#allocation4], 256  }
 0x169   :  { %187 = vsyncadd [#allocation4], 4294967040 }
 0x16a   :  { %106 = vsyncpa [#allocation3], 1 }
 0x16b   :  { %107 = vsyncpa [#allocation6], 1 }
 0x16c   :  { %108 = vsyncpa [#allocation4], 1 }

</bundles_post_ra>
